<compile_context>
chip_gen: v7x
topology: tpu7x:2x2x1
jax: 0.10.0
libtpu: 0.0.40
codegen_flags: <defaults>
</compile_context>

<pallas_src>
import functools

import jax
import jax.numpy as jnp
import numpy as np
from jax import lax
from jax.experimental import pallas as pl
from jax.experimental.pallas import tpu as pltpu


# ----------------------------- tuning knobs ---------------------------------
_TM_TARGET = 512                      # max matmul rows per tile
_TK_TARGET = 1024                     # max reduction (F_in) tile
_TN_TARGET = 512                      # max output-feature (F_out) tile
_STEP_BYTES_TARGET = 12 * 1024 * 1024  # per-grid-step working set (incl. 2x buffering)
_PACK_MAX_LANES = 1024                # lane-packed path cap on n*F_in and n*F_out
_VMEM_FRACTION = 0.75                 # fraction of physical VMEM handed to Mosaic


def _vmem_limit_bytes():
    """Generation-aware scoped-VMEM limit: ~96 MiB on 128-MiB parts, ~48 MiB on v7x."""
    cap = None
    try:
        cap = getattr(pltpu.get_tpu_info(), "vmem_capacity_bytes", None)
    except Exception:
        cap = None
    if not cap:
        cap = 64 * 1024 * 1024        # conservative (v7x-sized) default
    return int(min(cap * _VMEM_FRACTION, 100 * 1024 * 1024))


def _round_up(x, m):
    return ((x + m - 1) // m) * m


def _sublane(itemsize):
    """Rows per packed sublane group: 8 (4-byte), 16 (2-byte), 32 (1-byte)."""
    return max(8, 32 // max(1, itemsize))


def _fit_tile(dim, target, align):
    """Return (tile, padded_dim) with tile <= target and tile % align == 0.

    Prefers an aligned tile that divides `dim` exactly; otherwise pads `dim`
    up to a multiple of the aligned tile with the least padding (never falls
    back to a full huge dim that could exceed the VMEM budget)."""
    if dim <= target:
        return dim, dim
    top = max(align, (target // align) * align)
    t = top
    while t >= align:
        if dim % t == 0:
            return t, dim
        t -= align
    best_t, best_pad = align, _round_up(dim, align)
    t = top
    while t >= align:
        padded = _round_up(dim, t)
        if padded < best_pad or (padded == best_pad and t > best_t):
            best_t, best_pad = t, padded
        t -= align
    return best_t, best_pad


# ------------------------------- kernels -------------------------------------
def _kernel_acc(x_ref, w_ref, b_ref, o_ref, acc_ref):
    """Tiled-K path. x:(t,tm,tk) w:(t,tk,tn) b:(t,1,tn) o/acc:(t,tm,tn)."""
    k = pl.program_id(3)

    @pl.when(k == 0)
    def _init():
        # Fold the bias into the accumulator init: no bias add in the K loop.
        acc_ref[...] = jnp.broadcast_to(
            b_ref[...].astype(jnp.float32), acc_ref.shape)

    # Batched (M,K)x(K,N): MXU-native orientation, batch over the token dim.
    acc_ref[...] += lax.dot_general(
        x_ref[...], w_ref[...],
        dimension_numbers=(((2,), (1,)), ((0,), (0,))),
        preferred_element_type=jnp.float32)

    @pl.when(k == pl.num_programs(3) - 1)
    def _finalize():
        o_ref[...] = acc_ref[...].astype(o_ref.dtype)


def _kernel_single_k(x_ref, w_ref, b_ref, o_ref):
    """Single-K fast path: no scratch accumulator, direct output store."""
    y = lax.dot_general(
        x_ref[...], w_ref[...],
        dimension_numbers=(((2,), (1,)), ((0,), (0,))),
        preferred_element_type=jnp.float32)
    o_ref[...] = (y + b_ref[...].astype(jnp.float32)).astype(o_ref.dtype)


def _kernel_packed(x_ref, w_ref, b_ref, o_ref):
    """Lane-packed path: one dense (tm, n*F_in) @ (n*F_in, n*F_out) matmul."""
    y = jnp.dot(x_ref[...], w_ref[...], preferred_element_type=jnp.float32)
    o_ref[...] = (y + b_ref[...].astype(jnp.float32)).astype(o_ref.dtype)


# ------------------------------- drivers --------------------------------------
def _mlinear_packed(x_flat, w_t, biases):
    """Lane-packed small-F_out path.

    x_flat:(n,m,f_in), w_t:(n,f_in,f_out), biases:(n,f_out) -> (n,m,f_out).
    Tokens are folded into the lane dim (output last dim = n*f_out) via a
    block-diagonal weight so every load/store and the output DMA is lane-dense.
    """
    n, m, f_in = x_flat.shape
    f_out = w_t.shape[2]
    dtype = x_flat.dtype
    itemsize = jnp.dtype(dtype).itemsize
    kp, np_ = n * f_in, n * f_out

    tm, m_pad = _fit_tile(_round_up(m, _sublane(itemsize)), _TM_TARGET, 128)

    # Block-diagonal weight (n*f_in, n*f_out), built once per call in the
    # wrapper; the gate on _PACK_MAX_LANES keeps it <= a few MiB.
    eye = jnp.eye(n, dtype=w_t.dtype)
    w_bd = jnp.einsum("ts,tkf->tksf", eye, w_t).reshape(kp, np_)
    b_pack = biases.reshape(1, np_)

    x_pack = jnp.swapaxes(x_flat, 0, 1).reshape(m, kp)
    if m_pad != m:
        x_pack = jnp.pad(x_pack, ((0, m_pad - m), (0, 0)))

    bytes_accessed = (m_pad * kp + kp * np_ + np_ + m_pad * np_) * itemsize
    y_pack = pl.pallas_call(
        _kernel_packed,
        out_shape=jax.ShapeDtypeStruct((m_pad, np_), dtype),
        grid_spec=pltpu.PrefetchScalarGridSpec(
            num_scalar_prefetch=0,
            grid=(m_pad // tm,),
            in_specs=[
                pl.BlockSpec((tm, kp), lambda i: (i, 0)),
                # Constant block index -> packed weight is DMA'd once and
                # stays resident in VMEM across the whole M loop.
                pl.BlockSpec((kp, np_), lambda i: (0, 0)),
                pl.BlockSpec((1, np_), lambda i: (0, 0)),
            ],
            out_specs=pl.BlockSpec((tm, np_), lambda i: (i, 0)),
        ),
        compiler_params=pltpu.CompilerParams(
            dimension_semantics=("parallel",),
            vmem_limit_bytes=_vmem_limit_bytes(),
        ),
        cost_estimate=pl.CostEstimate(
            flops=2 * m_pad * kp * np_,
            transcendentals=0,
            bytes_accessed=int(bytes_accessed)),
    )(x_pack, w_bd, b_pack)

    y_pack = y_pack[:m]
    return jnp.swapaxes(y_pack.reshape(m, n, f_out), 0, 1)


def _mlinear_general(x_flat, w_t, biases, tk_target):
    """General tiled path. x_flat:(n,m,f_in), w_t:(n,f_in,f_out) -> (n,m,f_out)."""
    n, m, f_in = x_flat.shape
    f_out = w_t.shape[2]
    dtype = x_flat.dtype
    itemsize = jnp.dtype(dtype).itemsize
    sub = _sublane(itemsize)

    tm, m_pad = _fit_tile(_round_up(m, sub), _TM_TARGET, 128)
    tk, f_in_pad = _fit_tile(f_in, tk_target, 128)
    tn, f_out_pad = _fit_tile(f_out, _TN_TARGET, 128)
    k_steps = f_in_pad // tk
    single_k = k_steps == 1

    # --- token batching: amortize per-grid-step overhead.  The budget counts
    # the 2x double-buffering Pallas applies to each in/out BlockSpec. --------
    per_token = 2 * (tm * tk + tk * tn + tn + tm * tn) * itemsize
    if not single_k:
        per_token += tm * tn * 4            # f32 accumulator (single-buffered)
    t = max(1, min(n, _STEP_BYTES_TARGET // per_token))

    # v7x has 2 TensorCores: guarantee a parallel grid axis with extent >= 2
    # when the problem allows it (no-op on single-TC v5e/v6e).
    if n >= 2 and -(-n // t) < 2 and m_pad // tm < 2 and f_out_pad // tn < 2:
        t = (n + 1) // 2
    n_blocks = -(-n // t)
    t = -(-n // n_blocks)                   # minimize token padding
    n_pad = n_blocks * t

    # --- pad awkward sizes instead of full-dim fallback / t -> 1 collapse ----
    if (n_pad, m_pad, f_in_pad) != (n, m, f_in):
        x_flat = jnp.pad(
            x_flat, ((0, n_pad - n), (0, m_pad - m), (0, f_in_pad - f_in)))
    if (n_pad, f_in_pad, f_out_pad) != (n, f_in, f_out):
        w_t = jnp.pad(
            w_t, ((0, n_pad - n), (0, f_in_pad - f_in), (0, f_out_pad - f_out)))
    b3 = biases.reshape(n, 1, f_out)
    if (n_pad, f_out_pad) != (n, f_out):
        b3 = jnp.pad(b3, ((0, n_pad - n), (0, 0), (0, f_out_pad - f_out)))

    bytes_accessed = (n_pad * m_pad * f_in_pad + n_pad * f_in_pad * f_out_pad
                      + n_pad * f_out_pad + n_pad * m_pad * f_out_pad) * itemsize
    cost = pl.CostEstimate(
        flops=2 * n_pad * m_pad * f_in_pad * f_out_pad,
        transcendentals=0,
        bytes_accessed=int(bytes_accessed))
    params = pltpu.CompilerParams(
        dimension_semantics=(("parallel", "parallel", "parallel")
                             + (() if single_k else ("arbitrary",))),
        vmem_limit_bytes=_vmem_limit_bytes())
    out_shape = jax.ShapeDtypeStruct((n_pad, m_pad, f_out_pad), dtype)

    if single_k:
        # tk == F_in: no K grid axis, no scratch accumulator, direct store.
        y = pl.pallas_call(
            _kernel_single_k,
            out_shape=out_shape,
            grid_spec=pltpu.PrefetchScalarGridSpec(
                num_scalar_prefetch=0,
                grid=(n_pad // t, m_pad // tm, f_out_pad // tn),
                in_specs=[
                    pl.BlockSpec((t, tm, tk), lambda ti, i, j: (ti, i, 0)),
                    # Weight block index does not depend on i: when tn == F_out
                    # the tile stays resident across the entire M loop.
                    pl.BlockSpec((t, tk, tn), lambda ti, i, j: (ti, 0, j)),
                    pl.BlockSpec((t, 1, tn), lambda ti, i, j: (ti, 0, j)),
                ],
                out_specs=pl.BlockSpec((t, tm, tn), lambda ti, i, j: (ti, i, j)),
            ),
            compiler_params=params,
            cost_estimate=cost,
        )(x_flat, w_t, b3)
    else:
        y = pl.pallas_call(
            _kernel_acc,
            out_shape=out_shape,
            grid_spec=pltpu.PrefetchScalarGridSpec(
                num_scalar_prefetch=0,
                grid=(n_pad // t, m_pad // tm, f_out_pad // tn, k_steps),
                in_specs=[
                    pl.BlockSpec((t, tm, tk), lambda ti, i, j, k: (ti, i, k)),
                    pl.BlockSpec((t, tk, tn), lambda ti, i, j, k: (ti, k, j)),
                    pl.BlockSpec((t, 1, tn), lambda ti, i, j, k: (ti, 0, j)),
                ],
                out_specs=pl.BlockSpec((t, tm, tn), lambda ti, i, j, k: (ti, i, j)),
                scratch_shapes=[pltpu.VMEM((t, tm, tn), jnp.float32)],
            ),
            compiler_params=params,
            cost_estimate=cost,
        )(x_flat, w_t, b3)

    if (n_pad, m_pad, f_out_pad) != (n, m, f_out):
        y = y[:n, :m, :f_out]
    return y


@functools.partial(jax.jit, static_argnames=("tk_target",))
def mlinear_forward(x, weights, biases, tk_target=_TK_TARGET):
    """x: (..., n, in_features); weights: (n, out, in); biases: (n, out)."""
    n, f_out, f_in = weights.shape
    token_axis = x.ndim - 2

    # Token axis to the front (mirrors torch.swapaxes), flatten the rest to M.
    x_t = jnp.swapaxes(x, 0, token_axis)                  # (n, *rest, f_in)
    rest = x_t.shape[1:-1]
    m = int(np.prod(rest)) if rest else 1
    x_flat = x_t.reshape(n, m, f_in)

    # One-time wrapper transpose to the MXU-native (K, N) weight orientation.
    w_t = jnp.swapaxes(weights, 1, 2)                     # (n, f_in, f_out)

    use_packed = (f_out < 128 and n >= 2
                  and n * f_in <= _PACK_MAX_LANES
                  and n * f_out <= _PACK_MAX_LANES
                  and f_in <= tk_target)
    if use_packed:
        y_flat = _mlinear_packed(x_flat, w_t, biases)     # (n, m, f_out)
    else:
        y_flat = _mlinear_general(x_flat, w_t, biases, tk_target)

    y_t = y_flat.reshape((n,) + rest + (f_out,))
    # torch.stack(..., dim=token_axis) == moveaxis(stacked-at-0, 0, token_axis)
    return jnp.moveaxis(y_t, 0, token_axis)


def _mlinear_ref(x, weights, biases):
    """Pure-JAX mirror of the PyTorch module (incl. the >=4D axis-order quirk)."""
    token_axis = x.ndim - 2
    x_t = jnp.swapaxes(x, 0, token_axis)
    outs = [x_t[i] @ weights[i].T + biases[i] for i in range(weights.shape[0])]
    return jnp.stack(outs, axis=token_axis)


if __name__ == "__main__":
    key = jax.random.PRNGKey(0)
    keys = jax.random.split(key, 10)
    kx, kw, kb, kx4, kx2, kw2, kb2, kx3, kw3, kb3 = keys

    def check(y, y_ref, name, atol=1e-5):
        assert y.shape == y_ref.shape, (name, y.shape, y_ref.shape)
        np.testing.assert_allclose(np.asarray(y), np.asarray(y_ref),
                                   rtol=1e-5, atol=atol, err_msg=name)

    # Case 1: module-typical small shape (lane-packed path): B=2, n=8, 32 -> 32.
    B, N, F_IN, F_OUT = 2, 8, 32, 32
    bound = 1.0 / np.sqrt(F_IN)
    x = jax.random.normal(kx, (B, N, F_IN), dtype=jnp.float32)
    w = jax.random.uniform(kw, (N, F_OUT, F_IN), jnp.float32, -bound, bound)
    b = jax.random.uniform(kb, (N, F_OUT), jnp.float32, -bound, bound)
    y = jax.block_until_ready(mlinear_forward(x, w, b))
    check(y, _mlinear_ref(x, w, b), "3d_packed")

    # Case 2: 4-D input exercises the PyTorch leading-axis reorder quirk.
    x4 = jax.random.normal(kx4, (3, B, N, F_IN), dtype=jnp.float32)
    y4 = jax.block_until_ready(mlinear_forward(x4, w, b))
    check(y4, _mlinear_ref(x4, w, b), "4d_packed")

    # Case 3: F_OUT >= 128 -> general single-K path (no scratch accumulator).
    N2, F_IN2, F_OUT2 = 4, 32, 128
    bound2 = 1.0 / np.sqrt(F_IN2)
    x2 = jax.random.normal(kx2, (B, N2, F_IN2), dtype=jnp.float32)
    w2 = jax.random.uniform(kw2, (N2, F_OUT2, F_IN2), jnp.float32, -bound2, bound2)
    b2 = jax.random.uniform(kb2, (N2, F_OUT2), jnp.float32, -bound2, bound2)
    y2 = jax.block_until_ready(mlinear_forward(x2, w2, b2))
    check(y2, _mlinear_ref(x2, w2, b2), "general_single_k")

    # Case 4: shrink the K-tile target to exercise the tiled-K accumulator
    # kernel and the odd-token-count padding on a small shape.
    N3, F_IN3, F_OUT3 = 3, 256, 128
    bound3 = 1.0 / np.sqrt(F_IN3)
    x3 = jax.random.normal(kx3, (B, N3, F_IN3), dtype=jnp.float32)
    w3 = jax.random.uniform(kw3, (N3, F_OUT3, F_IN3), jnp.float32, -bound3, bound3)
    b3 = jax.random.uniform(kb3, (N3, F_OUT3), jnp.float32, -bound3, bound3)
    y3 = jax.block_until_ready(mlinear_forward(x3, w3, b3, tk_target=128))
    check(y3, _mlinear_ref(x3, w3, b3), "general_tiled_k", atol=3e-5)

    print("KERNEL_OK")
</pallas_src>

<mosaic_0001>
module attributes {stable_mosaic.version = 11 : i64} {
  func.func @_kernel_packed(%arg0: i32, %arg1: memref<8x256xf32, #tpu.memory_space<vmem>>, %arg2: memref<256x256xf32, #tpu.memory_space<vmem>>, %arg3: memref<1x256xf32, #tpu.memory_space<vmem>>, %arg4: memref<8x256xf32, #tpu.memory_space<vmem>>) attributes {dimension_semantics = [#tpu.dimension_semantics<parallel>], iteration_bounds = array<i64: 1>, scalar_prefetch = 0 : i64, scratch_operands = 0 : i64, tpu.core_type = #tpu.core_type<tc>, window_params = [{transform_indices = @transform_0, window_bounds = array<i64: 8, 256>}, {pipeline_mode = #tpu.pipeline_mode<synchronous>, transform_indices = @transform_1, window_bounds = array<i64: 256, 256>}, {pipeline_mode = #tpu.pipeline_mode<synchronous>, transform_indices = @transform_2, window_bounds = array<i64: 1, 256>}, {transform_indices = @transform_3, window_bounds = array<i64: 8, 256>}]} {
    %c0 = arith.constant 0 : index
    %c0_0 = arith.constant 0 : index
    %0 = vector.load %arg1[%c0, %c0_0] : memref<8x256xf32, #tpu.memory_space<vmem>>, vector<8x256xf32>
    %c0_1 = arith.constant 0 : index
    %c0_2 = arith.constant 0 : index
    %1 = vector.load %arg2[%c0_1, %c0_2] : memref<256x256xf32, #tpu.memory_space<vmem>>, vector<256x256xf32>
    %cst = arith.constant dense<0.000000e+00> : vector<8x256xf32>
    %2 = tpu.matmul %0, %1, %cst {dimension_numbers = #tpu.dot_dimension_numbers<[1], [0], [0], [1], [0, 0, 1, 1], [], []>} : vector<8x256xf32>, vector<256x256xf32>, vector<8x256xf32> -> vector<8x256xf32>
    %c0_3 = arith.constant 0 : index
    %c0_4 = arith.constant 0 : index
    %3 = vector.load %arg3[%c0_3, %c0_4] : memref<1x256xf32, #tpu.memory_space<vmem>>, vector<1x256xf32>
    %4 = vector.broadcast %3 : vector<1x256xf32> to vector<8x256xf32>
    %5 = arith.addf %2, %4 : vector<8x256xf32>
    %c0_5 = arith.constant 0 : index
    %c0_6 = arith.constant 0 : index
    %6 = vector.load %arg4[%c0_5, %c0_6] : memref<8x256xf32, #tpu.memory_space<vmem>>, vector<8x256xf32>
    tpu.vector_store %arg4[%c0_5, %c0_6], %5 {strides = array<i32>} : memref<8x256xf32, #tpu.memory_space<vmem>>, vector<8x256xf32>,
    return
  }
  func.func @transform_0(%arg0: i32) -> (i32, i32) {
    %c0_i32 = arith.constant 0 : i32
    %c0_i32_0 = arith.constant 0 : i32
    return %arg0, %c0_i32 : i32, i32
  }
  func.func @transform_1(%arg0: i32) -> (i32, i32) {
    %c0_i32 = arith.constant 0 : i32
    %c0_i32_0 = arith.constant 0 : i32
    %c0_i32_1 = arith.constant 0 : i32
    return %c0_i32, %c0_i32_0 : i32, i32
  }
  func.func @transform_2(%arg0: i32) -> (i32, i32) {
    %c0_i32 = arith.constant 0 : i32
    %c0_i32_0 = arith.constant 0 : i32
    %c0_i32_1 = arith.constant 0 : i32
    return %c0_i32, %c0_i32_0 : i32, i32
  }
  func.func @transform_3(%arg0: i32) -> (i32, i32) {
    %c0_i32 = arith.constant 0 : i32
    %c0_i32_0 = arith.constant 0 : i32
    return %arg0, %c0_i32 : i32, i32
  }
}

</mosaic_0001>

<bundles_post_ra>
// kernel: mlinear_forward.1
= control target key start
LH: loop header
LB: loop body
LE: loop exit
PB: predicated region body
PF: predicated region fallthrough
CT: control target
= control target key end

     0   :  { %s460_s1 = inlined_call_operand.vmem [shape: f32[256,256], index: 1, kind: input, shape index: {}]   ;;  %s461_s0 = inlined_call_operand.vmem [shape: f32[8,256], index: 0, kind: input, shape index: {}]   ;;  %s462_s2 = inlined_call_operand.vmem [shape: f32[1,256], index: 2, kind: input, shape index: {}]   ;;  %s463_s3 = inlined_call_operand.vmem [shape: f32[8,256], index: 3, kind: output, shape index: {}]  }
   0x1   :  { %v17_v0 = vld [vmem:[%s460_s1 + $0x8] sm:$0xff]  ;;  %v19_v1 = vld [vmem:[%s460_s1 + $0x18] sm:$0xff]  ;;  %v16_v2 = vld [vmem:[%s460_s1] sm:$0xff] }
   0x2   :  { %v169_v3 = vpack.c.bf16 %v19_v1, %v17_v0  ;;  %v18_v4 = vld [vmem:[%s460_s1 + $0x10] sm:$0xff]  ;;  %v21_v5 = vld [vmem:[%s460_s1 + $0x28] sm:$0xff]  ;;  %v23_v6 = vld [vmem:[%s460_s1 + $0x38] sm:$0xff] }
   0x3   :  { %v171_v7 = vpack.c.bf16 %v18_v4, %v16_v2  ;;  %v173_v8 = vpack.c.bf16 %v23_v6, %v21_v5  ;;  %v20_v9 = vld [vmem:[%s460_s1 + $0x20] sm:$0xff]  ;;  %v22_v10 = vld [vmem:[%s460_s1 + $0x30] sm:$0xff]  ;;  %v25_v11 = vld [vmem:[%s460_s1 + $0x48] sm:$0xff] }
   0x4   :  { %170 = vmatprep.subr.bf16.mxu0 %v169_v3  ;;  %v27_v12 = vld [vmem:[%s460_s1 + $0x58] sm:$0xff]  ;;  %v175_v13 = vpack.c.bf16 %v22_v10, %v20_v9  ;;  %v24_v15 = vld [vmem:[%s460_s1 + $0x40] sm:$0xff]  ;;  %v26_v16 = vld [vmem:[%s460_s1 + $0x50] sm:$0xff] }
   0x5   :  { %172 = vmatpush1.bf16.msra.mxu0 %v171_v7  ;;  %v177_v14 = vpack.c.bf16 %v27_v12, %v25_v11  ;;  %v29_v17 = vld [vmem:[%s460_s1 + $0x68] sm:$0xff]  ;;  %v31_v18 = vld [vmem:[%s460_s1 + $0x78] sm:$0xff]  ;;  %v179_v19 = vpack.c.bf16 %v26_v16, %v24_v15  ;;  %v28_v21 = vld [vmem:[%s460_s1 + $0x60] sm:$0xff] }
   0x6   :  { %174 = vmatprep.subr.bf16.mxu0 %v173_v8  ;;  %v181_v20 = vpack.c.bf16 %v31_v18, %v29_v17  ;;  %v30_v22 = vld [vmem:[%s460_s1 + $0x70] sm:$0xff]  ;;  %v33_v23 = vld [vmem:[%s460_s1 + $0x88] sm:$0xff]  ;;  %v35_v24 = vld [vmem:[%s460_s1 + $0x98] sm:$0xff] }
   0x7   :  { %v183_v25 = vpack.c.bf16 %v30_v22, %v28_v21  ;;  %v185_v26 = vpack.c.bf16 %v35_v24, %v33_v23  ;;  %v32_v27 = vld [vmem:[%s460_s1 + $0x80] sm:$0xff]  ;;  %v34_v28 = vld [vmem:[%s460_s1 + $0x90] sm:$0xff]  ;;  %v37_v29 = vld [vmem:[%s460_s1 + $0xa8] sm:$0xff] }
   0x8   :  { %v39_v30 = vld [vmem:[%s460_s1 + $0xb8] sm:$0xff]  ;;  %v187_v31 = vpack.c.bf16 %v34_v28, %v32_v27  ;;  %v36_v33 = vld [vmem:[%s460_s1 + $0xa0] sm:$0xff]  ;;  %v38_v34 = vld [vmem:[%s460_s1 + $0xb0] sm:$0xff] }
   0x9   :  { %176 = vmatpush1.bf16.msra.mxu0 %v175_v13  ;;  %v189_v32 = vpack.c.bf16 %v39_v30, %v37_v29  ;;  %v41_v35 = vld [vmem:[%s460_s1 + $0xc8] sm:$0xff]  ;;  %v43_v36 = vld [vmem:[%s460_s1 + $0xd8] sm:$0xff]  ;;  %v191_v37 = vpack.c.bf16 %v38_v34, %v36_v33  ;;  %v40_v39 = vld [vmem:[%s460_s1 + $0xc0] sm:$0xff]  ;;  %v82_v34 = vlaneseq }
   0xa   :  { %178 = vmatprep.subr.bf16.mxu0 %v177_v14  ;;  %v193_v38 = vpack.c.bf16 %v43_v36, %v41_v35  ;;  %v42_v40 = vld [vmem:[%s460_s1 + $0xd0] sm:$0xff]  ;;  %v15_v41 = vld [vmem:[%s461_s0 + $0x8] sm:$0xff]  ;;  %v47_v43 = vld [vmem:[%s460_s1 + $0xf8] sm:$0xff] }
   0xb   :  { %v45_v42 = vld [vmem:[%s460_s1 + $0xe8] sm:$0xff]  ;;  %156 = vmatprep.mubr.f32.mxu0 %v15_v41  ;;  %v195_v44 = vpack.c.bf16 %v42_v40, %v40_v39  ;;  %v44_v46 = vld [vmem:[%s460_s1 + $0xe0] sm:$0xff]  ;;  %v46_v47 = vld [vmem:[%s460_s1 + $0xf0] sm:$0xff]  ;;  %v83_v35 = vshrl.u32 %v82_v34, 7 }
   0xc   :  { %v197_v45 = vpack.c.bf16 %v47_v43, %v45_v42  ;;  %v49_v48 = vld [vmem:[%s460_s1 + $0x108] sm:$0xff]  ;;  %v51_v49 = vld [vmem:[%s460_s1 + $0x118] sm:$0xff]  ;;  %v199_v50 = vpack.c.bf16 %v46_v47, %v44_v46  ;;  %v48_v52 = vld [vmem:[%s460_s1 + $0x100] sm:$0xff] }
   0xd   :  { %180 = vmatpush1.bf16.msra.mxu0 %v179_v19  ;;  %v201_v51 = vpack.c.bf16 %v51_v49, %v49_v48  ;;  %v50_v53 = vld [vmem:[%s460_s1 + $0x110] sm:$0xff]  ;;  %v53_v54 = vld [vmem:[%s460_s1 + $0x128] sm:$0xff]  ;;  %v55_v55 = vld [vmem:[%s460_s1 + $0x138] sm:$0xff]  ;;  %v84_v36 = vsub.s32 0, %v83_v35 }
   0xe   :  { %182 = vmatprep.subr.bf16.mxu0 %v181_v20  ;;  %v203_v56 = vpack.c.bf16 %v50_v53, %v48_v52  ;;  %v205_v57 = vpack.c.bf16 %v55_v55, %v53_v54  ;;  %v52_v58 = vld [vmem:[%s460_s1 + $0x120] sm:$0xff]  ;;  %v54_v59 = vld [vmem:[%s460_s1 + $0x130] sm:$0xff]  ;;  %v57_v60 = vld [vmem:[%s460_s1 + $0x148] sm:$0xff] }
   0xf   :  { %v59_v61 = vld [vmem:[%s460_s1 + $0x158] sm:$0xff]  ;;  %v207_v62 = vpack.c.bf16 %v54_v59, %v52_v58  ;;  %v56_v0 = vld [vmem:[%s460_s1 + $0x140] sm:$0xff]  ;;  %v58_v1 = vld [vmem:[%s460_s1 + $0x150] sm:$0xff] }
  0x10   :  { %v209_v63 = vpack.c.bf16 %v59_v61, %v57_v60  ;;  %v61_v2 = vld [vmem:[%s460_s1 + $0x168] sm:$0xff]  ;;  %v63_v3 = vld [vmem:[%s460_s1 + $0x178] sm:$0xff]  ;;  %v211_v4 = vpack.c.bf16 %v58_v1, %v56_v0  ;;  %v60_v6 = vld [vmem:[%s460_s1 + $0x160] sm:$0xff] }
  0x11   :  { %184 = vmatpush1.bf16.msra.mxu0 %v183_v25  ;;  %v213_v5 = vpack.c.bf16 %v63_v3, %v61_v2  ;;  %v62_v7 = vld [vmem:[%s460_s1 + $0x170] sm:$0xff]  ;;  %v65_v8 = vld [vmem:[%s460_s1 + $0x188] sm:$0xff]  ;;  %v67_v9 = vld [vmem:[%s460_s1 + $0x198] sm:$0xff] }
  0x12   :  { %186 = vmatprep.subr.bf16.mxu0 %v185_v26  ;;  %v215_v10 = vpack.c.bf16 %v62_v7, %v60_v6  ;;  %v217_v11 = vpack.c.bf16 %v67_v9, %v65_v8  ;;  %v64_v12 = vld [vmem:[%s460_s1 + $0x180] sm:$0xff]  ;;  %v66_v13 = vld [vmem:[%s460_s1 + $0x190] sm:$0xff]  ;;  %v69_v14 = vld [vmem:[%s460_s1 + $0x1a8] sm:$0xff] }
  0x13   :  { %v71_v15 = vld [vmem:[%s460_s1 + $0x1b8] sm:$0xff]  ;;  %v219_v16 = vpack.c.bf16 %v66_v13, %v64_v12  ;;  %v68_v18 = vld [vmem:[%s460_s1 + $0x1a0] sm:$0xff]  ;;  %v70_v19 = vld [vmem:[%s460_s1 + $0x1b0] sm:$0xff] }
  0x14   :  { %v221_v17 = vpack.c.bf16 %v71_v15, %v69_v14  ;;  %v73_v20 = vld [vmem:[%s460_s1 + $0x1c8] sm:$0xff]  ;;  %v75_v21 = vld [vmem:[%s460_s1 + $0x1d8] sm:$0xff]  ;;  %v223_v22 = vpack.c.bf16 %v70_v19, %v68_v18  ;;  %v72_v24 = vld [vmem:[%s460_s1 + $0x1c0] sm:$0xff] }
  0x15   :  { %188 = vmatpush1.bf16.msra.mxu0 %v187_v31  ;;  %v225_v23 = vpack.c.bf16 %v75_v21, %v73_v20  ;;  %v74_v25 = vld [vmem:[%s460_s1 + $0x1d0] sm:$0xff]  ;;  %v77_v26 = vld [vmem:[%s460_s1 + $0x1e8] sm:$0xff]  ;;  %v79_v27 = vld [vmem:[%s460_s1 + $0x1f8] sm:$0xff] }
  0x16   :  { %190 = vmatprep.subr.bf16.mxu0 %v189_v32  ;;  %v227_v28 = vpack.c.bf16 %v74_v25, %v72_v24  ;;  %v229_v29 = vpack.c.bf16 %v79_v27, %v77_v26  ;;  %v76_v30 = vld [vmem:[%s460_s1 + $0x1e0] sm:$0xff]  ;;  %v78_v31 = vld [vmem:[%s460_s1 + $0x1f0] sm:$0xff] }
  0x17   :  { %v231_v32 = vpack.c.bf16 %v78_v31, %v76_v30  ;;  %v14_v33 = vld [vmem:[%s461_s0] sm:$0xff] }
  0x19   :  { %192 = vmatpush1.bf16.msra.mxu0 %v191_v37  ;;  %v80_v37 = vld [vmem:[%s462_s2] sm:$0x3] }
  0x1a   :  { %194 = vmatprep.subr.bf16.mxu0 %v193_v38  ;;  %v88_v38 = vsub.s32 1, %v83_v35  ;;  %v85_v39 = vrot.slane %v80_v37, %v84_v36 }
  0x1c   :  { %v89_v40 = vrot.slane %v80_v37, %v88_v38 }
  0x1d   :  { %196 = vmatpush1.bf16.msra.mxu0 %v195_v44 }
  0x1e   :  { %198 = vmatprep.subr.bf16.mxu0 %v197_v45 }
  0x21   :  { %200 = vmatpush1.bf16.msra.mxu0 %v199_v50 }
  0x22   :  { %202 = vmatprep.subr.bf16.mxu0 %v201_v51 }
  0x25   :  { %204 = vmatpush1.bf16.msra.mxu0 %v203_v56 }
  0x26   :  { %206 = vmatprep.subr.bf16.mxu0 %v205_v57 }
  0x29   :  { %208 = vmatpush1.bf16.msra.mxu0 %v207_v62 }
  0x2a   :  { %210 = vmatprep.subr.bf16.mxu0 %v209_v63 }
  0x2d   :  { %212 = vmatpush1.bf16.msra.mxu0 %v211_v4 }
  0x2e   :  { %214 = vmatprep.subr.bf16.mxu0 %v213_v5 }
  0x31   :  { %216 = vmatpush1.bf16.msra.mxu0 %v215_v10 }
  0x32   :  { %218 = vmatprep.subr.bf16.mxu0 %v217_v11 }
  0x35   :  { %220 = vmatpush1.bf16.msra.mxu0 %v219_v16 }
  0x36   :  { %222 = vmatprep.subr.bf16.mxu0 %v221_v17 }
  0x39   :  { %224 = vmatpush1.bf16.msra.mxu0 %v223_v22 }
  0x3a   :  { %226 = vmatprep.subr.bf16.mxu0 %v225_v23 }
  0x3d   :  { %228 = vmatpush1.bf16.msra.mxu0 %v227_v28 }
  0x3e   :  { %230 = vmatprep.subr.bf16.mxu0 %v229_v29 }
  0x41   :  { %232 = vmatpush1.bf16.msra.mxu0 %v231_v32 }
  0x44   :  { %157 = vmatmul.mubr.f32.vlgmr.msra.gmra.mrb[0].mxu0 %v14_v33 }
 0x117   :  { %v158_v41 = vpop.f32.mrb[0].mxu0 }
 0x118   :  { %v159_v42 = vadd.f32 %v158_v41, %v85_v39  ;;  %v160_v43 = vpop.f32.mrb[1].mxu0 }
 0x119   :  { %v161_v44 = vadd.f32 %v160_v43, %v89_v40 }
 0x11a   :  { %163 = vst [vmem:[%s463_s3] sm:$0xff] %v159_v42 }
 0x11b   :  { %164 = vst [vmem:[%s463_s3 + $0x8] sm:$0xff] %v161_v44 }

</bundles_post_ra>
